<compile_context>
chip_gen: v7x
topology: tpu7x:2x2x1
jax: 0.10.0
libtpu: 0.0.40
codegen_flags: <defaults>
</compile_context>

<pallas_src>
import jax
import jax.numpy as jnp
from jax.experimental import pallas as pl
from jax.experimental.pallas import tpu as pltpu


def ffn_kernel(x_ref, latproj_ref, gamma_ref, beta_ref,
               w1h_ref, w2_ref, b2_ref, o_ref, xnorm_ref, acc_ref):
    f = pl.program_id(2)

    @pl.when(f == 0)
    def _():
        x = x_ref[...].astype(jnp.float32)                       # (tm, H)
        # Fused-moment LayerNorm (eps = 1e-6, matches nn.LayerNorm)
        mean = jnp.mean(x, axis=-1, keepdims=True)
        mean_sq = jnp.mean(x * x, axis=-1, keepdims=True)
        var = mean_sq - mean * mean
        xn = (x - mean) * jax.lax.rsqrt(var + 1e-6)
        xn = xn * gamma_ref[...] + beta_ref[...]
        xnorm_ref[...] = xn.astype(xnorm_ref.dtype)
        acc_ref[...] = jnp.zeros_like(acc_ref)

    # Linear(hidden+latent -> ff) restricted to this F slice, then ReLU.
    # latproj_ref already holds (latent @ W1[H:] + b1) for this batch/F slice.
    h = jnp.dot(xnorm_ref[...], w1h_ref[...],
                preferred_element_type=jnp.float32)               # (tm, tf)
    h = jnp.maximum(h + latproj_ref[...], 0.0)
    # TODO(synk): dropout is identity in eval/inference; not implemented in-kernel.

    # Linear(ff -> hidden) slice, accumulated over F tiles in f32.
    acc_ref[...] += jnp.dot(h.astype(w2_ref.dtype), w2_ref[...],
                            preferred_element_type=jnp.float32)

    @pl.when(f == pl.num_programs(2) - 1)
    def _():
        # Residual re-reads x from the resident input block (no long f32 live range).
        y = acc_ref[...] + b2_ref[...] + x_ref[...].astype(jnp.float32)
        o_ref[...] = y.astype(o_ref.dtype)


def _round_up(a, b):
    return (a + b - 1) // b * b


def _vmem_capacity_bytes():
    try:
        return int(pltpu.get_tpu_info().vmem_capacity_bytes)
    except Exception:
        pass
    try:
        if "v7" in jax.devices()[0].device_kind.lower():
            return 64 * 1024 * 1024
    except Exception:
        pass
    return 128 * 1024 * 1024          # v5e / v6e physical VMEM


def _choose_tiles(H, F, S, vmem_limit, cdt_size, out_size):
    """Pick (tm, tf, nf, f_pad) so double-buffered blocks + scratch fit VMEM."""
    budget = int(vmem_limit * 0.80)

    # --- tf: slice of the ff dim; ~40% of budget for double-buffered weight slices.
    w_bytes_per_f = 2 * H * cdt_size                  # one W1 column + one W2 row
    tf_cap = max(1, int(budget * 0.4) // (2 * w_bytes_per_f))
    if tf_cap >= F:
        tf, nf, f_pad = F, 1, F                        # weights fully resident
    else:
        align = 256 if tf_cap >= 256 else 128          # 256-wide MXU on v6e/v7x
        step = max(align, (tf_cap // align) * align)
        nf = -(-F // step)
        tf = _round_up(-(-F // nf), align)
        f_pad = tf * nf

    # --- tm: sequence rows per tile ---
    fixed = 2 * 2 * H * tf * cdt_size                  # W1/W2 slices, double-buffered
    fixed += 2 * (3 * H * 4) + 2 * tf * 4              # gamma/beta/b2 + latent slice
    per_row = (2 * H * 4                               # x input block (f32, 2 bufs)
               + 2 * H * out_size                      # output block (2 bufs)
               + H * cdt_size + H * 4                  # x_norm + acc scratch
               + tf * (4 + cdt_size + 2))              # h intermediate (+ slack)
    tm = max(8, (budget - fixed) // per_row)
    if tm >= 1024:
        tm = 1024
    elif tm >= 256:
        tm = (tm // 256) * 256                         # MXU-aligned big tiles
    elif tm >= 128:
        tm = 128
    else:
        tm = max(8, (tm // 16) * 16)                   # bf16 sublane packing
    tm = min(tm, _round_up(S, 8))
    tm = max(8, (tm // 8) * 8)
    return tm, tf, nf, f_pad


def decoder_pwff(x, latent, gamma, beta, w1, b1, w2, b2, *,
                 compute_dtype=jnp.bfloat16, out_dtype=None):
    """
    x:      (B, S, H) float32
    latent: (B, L)    float32
    w1:     (H + L, F), b1: (F,)   -- first Linear (in x out layout)
    w2:     (F, H),     b2: (H,)   -- second Linear
    """
    B, S, H = x.shape
    F = w1.shape[1]
    out_dtype = x.dtype if out_dtype is None else out_dtype

    vmem_cap = _vmem_capacity_bytes()
    vmem_limit = int(max(vmem_cap - 16 * 1024 * 1024, vmem_cap // 2))

    cdt_size = jnp.dtype(compute_dtype).itemsize
    out_size = jnp.dtype(out_dtype).itemsize
    tm, tf, nf, f_pad = _choose_tiles(H, F, S, vmem_limit, cdt_size, out_size)

    # Fold the latent half of the concat into a per-batch projection:
    #   concat([x_norm, latent]) @ W1 == x_norm @ W1[:H] + (latent @ W1[H:] + b1)
    w1h = w1[:H, :].astype(compute_dtype)              # (H, F)
    lat_proj = latent @ w1[H:, :] + b1                 # (B, F) f32
    w2c = w2.astype(compute_dtype)                     # (F, H)
    if f_pad != F:                                     # weight-only zero pad along F:
        w1h = jnp.pad(w1h, ((0, 0), (0, f_pad - F)))   # relu(0)=0 times zero W2 rows
        lat_proj = jnp.pad(lat_proj, ((0, 0), (0, f_pad - F)))
        w2c = jnp.pad(w2c, ((0, f_pad - F), (0, 0)))
    lat_proj = lat_proj.reshape(B, 1, f_pad).astype(jnp.float32)
    gammar = gamma.reshape(1, H).astype(jnp.float32)
    betar = beta.reshape(1, H).astype(jnp.float32)
    b2r = b2.reshape(1, H).astype(jnp.float32)

    # Ragged S tail handled by the pipeline (no jnp.pad / output slice HBM passes).
    grid = (B, pl.cdiv(S, tm), nf)

    cost = pl.CostEstimate(
        flops=4 * B * S * H * F,
        transcendentals=B * S,
        bytes_accessed=2 * B * S * H * 4 + 2 * H * f_pad * cdt_size + B * f_pad * 4,
    )

    return pl.pallas_call(
        ffn_kernel,
        out_shape=jax.ShapeDtypeStruct((B, S, H), out_dtype),
        grid_spec=pltpu.PrefetchScalarGridSpec(
            num_scalar_prefetch=0,
            grid=grid,
            in_specs=[
                pl.BlockSpec((None, tm, H), lambda b, s, f: (b, s, 0)),   # x rows
                pl.BlockSpec((None, 1, tf), lambda b, s, f: (b, 0, f)),   # latent proj
                pl.BlockSpec((1, H), lambda b, s, f: (0, 0)),             # gamma
                pl.BlockSpec((1, H), lambda b, s, f: (0, 0)),             # beta
                pl.BlockSpec((H, tf), lambda b, s, f: (0, f)),            # W1 slice
                pl.BlockSpec((tf, H), lambda b, s, f: (f, 0)),            # W2 slice
                pl.BlockSpec((1, H), lambda b, s, f: (0, 0)),             # b2
            ],
            out_specs=pl.BlockSpec((None, tm, H), lambda b, s, f: (b, s, 0)),
            scratch_shapes=[pltpu.VMEM((tm, H), compute_dtype),   # cached x_norm
                            pltpu.VMEM((tm, H), jnp.float32)],    # y accumulator
        ),
        compiler_params=pltpu.CompilerParams(
            dimension_semantics=("parallel", "parallel", "arbitrary"),
            vmem_limit_bytes=vmem_limit),
        cost_estimate=cost,
    )(x, lat_proj, gammar, betar, w1h, w2c, b2r)


def reference(x, latent, gamma, beta, w1, b1, w2, b2):
    B, S, H = x.shape
    L = latent.shape[-1]
    mean = jnp.mean(x, axis=-1, keepdims=True)
    var = jnp.mean((x - mean) ** 2, axis=-1, keepdims=True)
    xn = (x - mean) / jnp.sqrt(var + 1e-6) * gamma + beta
    lat = jnp.broadcast_to(latent[:, None, :], (B, S, L))
    xc = jnp.concatenate([xn, lat], axis=-1)
    h = jnp.maximum(xc @ w1 + b1, 0.0)
    return h @ w2 + b2 + x


if __name__ == "__main__":
    # Small shapes consistent with the module's forward
    B, S, H, L, F = 2, 8, 32, 16, 64
    key = jax.random.PRNGKey(0)
    k = jax.random.split(key, 6)

    x = jax.random.normal(k[0], (B, S, H), jnp.float32)
    latent = jax.random.normal(k[1], (B, L), jnp.float32)

    # Deterministic parameter init (synthetic, not a checkpoint)
    gamma = jnp.ones((H,), jnp.float32)
    beta = jnp.zeros((H,), jnp.float32)
    w1 = jax.random.normal(k[2], (H + L, F), jnp.float32) * 0.05
    b1 = jax.random.normal(k[3], (F,), jnp.float32) * 0.01
    w2 = jax.random.normal(k[4], (F, H), jnp.float32) * 0.05
    b2 = jax.random.normal(k[5], (H,), jnp.float32) * 0.01

    out = decoder_pwff(x, latent, gamma, beta, w1, b1, w2, b2)
    jax.block_until_ready(out)

    ref = reference(x, latent, gamma, beta, w1, b1, w2, b2)
    assert out.shape == (B, S, H)
    # bf16 matmul operands (f32 accumulation) -> looser tolerance vs pure-f32 ref.
    err = jnp.max(jnp.abs(out - ref))
    assert jnp.allclose(out, ref, atol=5e-2, rtol=5e-2), f"max err {err}"
    print("KERNEL_OK")
</pallas_src>

<mosaic_0001>
module attributes {stable_mosaic.version = 11 : i64} {
  func.func @ffn_kernel(%arg0: i32, %arg1: i32, %arg2: i32, %arg3: memref<1x8x32xf32, #tpu.memory_space<vmem>>, %arg4: memref<1x1x64xf32, #tpu.memory_space<vmem>>, %arg5: memref<1x32xf32, #tpu.memory_space<vmem>>, %arg6: memref<1x32xf32, #tpu.memory_space<vmem>>, %arg7: memref<32x64xbf16, #tpu.memory_space<vmem>>, %arg8: memref<64x32xbf16, #tpu.memory_space<vmem>>, %arg9: memref<1x32xf32, #tpu.memory_space<vmem>>, %arg10: memref<1x8x32xf32, #tpu.memory_space<vmem>>, %arg11: memref<8x32xbf16, #tpu.memory_space<vmem>>, %arg12: memref<8x32xf32, #tpu.memory_space<vmem>>) attributes {dimension_semantics = [#tpu.dimension_semantics<parallel>, #tpu.dimension_semantics<parallel>, #tpu.dimension_semantics<arbitrary>], iteration_bounds = array<i64: 2, 1, 1>, scalar_prefetch = 0 : i64, scratch_operands = 2 : i64, tpu.core_type = #tpu.core_type<tc>, window_params = [{transform_indices = @transform_0, window_bounds = array<i64: 1, 8, 32>}, {transform_indices = @transform_1, window_bounds = array<i64: 1, 1, 64>}, {pipeline_mode = #tpu.pipeline_mode<synchronous>, transform_indices = @transform_2, window_bounds = array<i64: 1, 32>}, {pipeline_mode = #tpu.pipeline_mode<synchronous>, transform_indices = @transform_3, window_bounds = array<i64: 1, 32>}, {transform_indices = @transform_4, window_bounds = array<i64: 32, 64>}, {transform_indices = @transform_5, window_bounds = array<i64: 64, 32>}, {pipeline_mode = #tpu.pipeline_mode<synchronous>, transform_indices = @transform_6, window_bounds = array<i64: 1, 32>}, {transform_indices = @transform_7, window_bounds = array<i64: 1, 8, 32>}]} {
    %c0_i32 = arith.constant 0 : i32
    %0 = arith.cmpi eq, %arg2, %c0_i32 : i32
    %1 = arith.extui %0 : i1 to i32
    %c0_i32_0 = arith.constant 0 : i32
    %2 = arith.cmpi ne, %1, %c0_i32_0 : i32
    scf.if %2 {
      %c0_17 = arith.constant 0 : index
      %c0_18 = arith.constant 0 : index
      %c0_19 = arith.constant 0 : index
      %21 = vector.load %arg3[%c0_17, %c0_18, %c0_19] : memref<1x8x32xf32, #tpu.memory_space<vmem>>, vector<1x8x32xf32>
      %22 = vector.shape_cast %21 : vector<1x8x32xf32> to vector<8x32xf32>
      %cst_20 = arith.constant dense<0.000000e+00> : vector<8xf32>
      %23 = vector.multi_reduction <add>, %22, %cst_20 [1] : vector<8x32xf32> to vector<8xf32>
      %24 = vector.shape_cast %23 : vector<8xf32> to vector<8x1xf32>
      %cst_21 = arith.constant 3.200000e+01 : f32
      %25 = vector.broadcast %cst_21 : f32 to vector<8x1xf32>
      %26 = arith.divf %24, %25 : vector<8x1xf32>
      %27 = arith.mulf %22, %22 : vector<8x32xf32>
      %cst_22 = arith.constant dense<0.000000e+00> : vector<8xf32>
      %28 = vector.multi_reduction <add>, %27, %cst_22 [1] : vector<8x32xf32> to vector<8xf32>
      %29 = vector.shape_cast %28 : vector<8xf32> to vector<8x1xf32>
      %cst_23 = arith.constant 3.200000e+01 : f32
      %30 = vector.broadcast %cst_23 : f32 to vector<8x1xf32>
      %31 = arith.divf %29, %30 : vector<8x1xf32>
      %32 = arith.mulf %26, %26 : vector<8x1xf32>
      %33 = arith.subf %31, %32 : vector<8x1xf32>
      %34 = vector.broadcast %26 : vector<8x1xf32> to vector<8x32xf32>
      %35 = arith.subf %22, %34 : vector<8x32xf32>
      %cst_24 = arith.constant 9.99999997E-7 : f32
      %36 = vector.broadcast %cst_24 : f32 to vector<8x1xf32>
      %37 = arith.addf %33, %36 : vector<8x1xf32>
      %38 = math.rsqrt %37 : vector<8x1xf32>
      %39 = vector.broadcast %38 : vector<8x1xf32> to vector<8x32xf32>
      %40 = arith.mulf %35, %39 : vector<8x32xf32>
      %c0_25 = arith.constant 0 : index
      %c0_26 = arith.constant 0 : index
      %41 = vector.load %arg5[%c0_25, %c0_26] : memref<1x32xf32, #tpu.memory_space<vmem>>, vector<1x32xf32>
      %42 = vector.broadcast %41 : vector<1x32xf32> to vector<8x32xf32>
      %43 = arith.mulf %40, %42 : vector<8x32xf32>
      %c0_27 = arith.constant 0 : index
      %c0_28 = arith.constant 0 : index
      %44 = vector.load %arg6[%c0_27, %c0_28] : memref<1x32xf32, #tpu.memory_space<vmem>>, vector<1x32xf32>
      %45 = vector.broadcast %44 : vector<1x32xf32> to vector<8x32xf32>
      %46 = arith.addf %43, %45 : vector<8x32xf32>
      %47 = arith.truncf %46 : vector<8x32xf32> to vector<8x32xbf16>
      %c0_29 = arith.constant 0 : index
      %c0_30 = arith.constant 0 : index
      %48 = vector.load %arg11[%c0_29, %c0_30] : memref<8x32xbf16, #tpu.memory_space<vmem>>, vector<8x32xbf16>
      tpu.vector_store %arg11[%c0_29, %c0_30], %47 {strides = array<i32>} : memref<8x32xbf16, #tpu.memory_space<vmem>>, vector<8x32xbf16>,
      %cst_31 = arith.constant 0.000000e+00 : f32
      %49 = vector.broadcast %cst_31 : f32 to vector<8x32xf32>
      %c0_32 = arith.constant 0 : index
      %c0_33 = arith.constant 0 : index
      %50 = vector.load %arg12[%c0_32, %c0_33] : memref<8x32xf32, #tpu.memory_space<vmem>>, vector<8x32xf32>
      tpu.vector_store %arg12[%c0_32, %c0_33], %49 {strides = array<i32>} : memref<8x32xf32, #tpu.memory_space<vmem>>, vector<8x32xf32>,
    } else {
    }
    %c0 = arith.constant 0 : index
    %c0_1 = arith.constant 0 : index
    %3 = vector.load %arg11[%c0, %c0_1] : memref<8x32xbf16, #tpu.memory_space<vmem>>, vector<8x32xbf16>
    %c0_2 = arith.constant 0 : index
    %c0_3 = arith.constant 0 : index
    %4 = vector.load %arg7[%c0_2, %c0_3] : memref<32x64xbf16, #tpu.memory_space<vmem>>, vector<32x64xbf16>
    %cst = arith.constant dense<0.000000e+00> : vector<8x64xf32>
    %5 = tpu.matmul %3, %4, %cst {dimension_numbers = #tpu.dot_dimension_numbers<[1], [0], [0], [1], [0, 0, 1, 1], [], []>} : vector<8x32xbf16>, vector<32x64xbf16>, vector<8x64xf32> -> vector<8x64xf32>
    %c0_4 = arith.constant 0 : index
    %c0_5 = arith.constant 0 : index
    %c0_6 = arith.constant 0 : index
    %6 = vector.load %arg4[%c0_4, %c0_5, %c0_6] : memref<1x1x64xf32, #tpu.memory_space<vmem>>, vector<1x1x64xf32>
    %7 = vector.shape_cast %6 : vector<1x1x64xf32> to vector<1x64xf32>
    %8 = vector.broadcast %7 : vector<1x64xf32> to vector<8x64xf32>
    %9 = arith.addf %5, %8 : vector<8x64xf32>
    %cst_7 = arith.constant 0.000000e+00 : f32
    %10 = vector.broadcast %cst_7 : f32 to vector<8x64xf32>
    %11 = arith.maximumf %9, %10 : vector<8x64xf32>
    %c0_8 = arith.constant 0 : index
    %c0_9 = arith.constant 0 : index
    %12 = vector.load %arg12[%c0_8, %c0_9] : memref<8x32xf32, #tpu.memory_space<vmem>>, vector<8x32xf32>
    %13 = arith.truncf %11 : vector<8x64xf32> to vector<8x64xbf16>
    %c0_10 = arith.constant 0 : index
    %c0_11 = arith.constant 0 : index
    %14 = vector.load %arg8[%c0_10, %c0_11] : memref<64x32xbf16, #tpu.memory_space<vmem>>, vector<64x32xbf16>
    %cst_12 = arith.constant dense<0.000000e+00> : vector<8x32xf32>
    %15 = tpu.matmul %13, %14, %cst_12 {dimension_numbers = #tpu.dot_dimension_numbers<[1], [0], [0], [1], [0, 0, 1, 1], [], []>} : vector<8x64xbf16>, vector<64x32xbf16>, vector<8x32xf32> -> vector<8x32xf32>
    %16 = arith.addf %12, %15 : vector<8x32xf32>
    %c0_13 = arith.constant 0 : index
    %c0_14 = arith.constant 0 : index
    %17 = vector.load %arg12[%c0_13, %c0_14] : memref<8x32xf32, #tpu.memory_space<vmem>>, vector<8x32xf32>
    tpu.vector_store %arg12[%c0_13, %c0_14], %16 {strides = array<i32>} : memref<8x32xf32, #tpu.memory_space<vmem>>, vector<8x32xf32>,
    %c0_i32_15 = arith.constant 0 : i32
    %18 = arith.cmpi eq, %arg2, %c0_i32_15 : i32
    %19 = arith.extui %18 : i1 to i32
    %c0_i32_16 = arith.constant 0 : i32
    %20 = arith.cmpi ne, %19, %c0_i32_16 : i32
    scf.if %20 {
      %c0_17 = arith.constant 0 : index
      %c0_18 = arith.constant 0 : index
      %21 = vector.load %arg12[%c0_17, %c0_18] : memref<8x32xf32, #tpu.memory_space<vmem>>, vector<8x32xf32>
      %c0_19 = arith.constant 0 : index
      %c0_20 = arith.constant 0 : index
      %22 = vector.load %arg9[%c0_19, %c0_20] : memref<1x32xf32, #tpu.memory_space<vmem>>, vector<1x32xf32>
      %23 = vector.broadcast %22 : vector<1x32xf32> to vector<8x32xf32>
      %24 = arith.addf %21, %23 : vector<8x32xf32>
      %c0_21 = arith.constant 0 : index
      %c0_22 = arith.constant 0 : index
      %c0_23 = arith.constant 0 : index
      %25 = vector.load %arg3[%c0_21, %c0_22, %c0_23] : memref<1x8x32xf32, #tpu.memory_space<vmem>>, vector<1x8x32xf32>
      %26 = vector.shape_cast %25 : vector<1x8x32xf32> to vector<8x32xf32>
      %27 = arith.addf %24, %26 : vector<8x32xf32>
      %c0_24 = arith.constant 0 : index
      %c0_25 = arith.constant 0 : index
      %c0_26 = arith.constant 0 : index
      %28 = vector.load %arg10[%c0_24, %c0_25, %c0_26] : memref<1x8x32xf32, #tpu.memory_space<vmem>>, vector<1x8x32xf32>
      %29 = vector.shape_cast %28 : vector<1x8x32xf32> to vector<8x32xf32>
      %30 = vector.shape_cast %27 : vector<8x32xf32> to vector<1x8x32xf32>
      tpu.vector_store %arg10[%c0_24, %c0_25, %c0_26], %30 {strides = array<i32>} : memref<1x8x32xf32, #tpu.memory_space<vmem>>, vector<1x8x32xf32>,
    } else {
    }
    return
  }
  func.func @transform_0(%arg0: i32, %arg1: i32, %arg2: i32) -> (i32, i32, i32) {
    %c0_i32 = arith.constant 0 : i32
    %c0_i32_0 = arith.constant 0 : i32
    return %arg0, %arg1, %c0_i32 : i32, i32, i32
  }
  func.func @transform_1(%arg0: i32, %arg1: i32, %arg2: i32) -> (i32, i32, i32) {
    %c0_i32 = arith.constant 0 : i32
    %c0_i32_0 = arith.constant 0 : i32
    return %arg0, %c0_i32, %arg2 : i32, i32, i32
  }
  func.func @transform_2(%arg0: i32, %arg1: i32, %arg2: i32) -> (i32, i32) {
    %c0_i32 = arith.constant 0 : i32
    %c0_i32_0 = arith.constant 0 : i32
    %c0_i32_1 = arith.constant 0 : i32
    return %c0_i32, %c0_i32_0 : i32, i32
  }
  func.func @transform_3(%arg0: i32, %arg1: i32, %arg2: i32) -> (i32, i32) {
    %c0_i32 = arith.constant 0 : i32
    %c0_i32_0 = arith.constant 0 : i32
    %c0_i32_1 = arith.constant 0 : i32
    return %c0_i32, %c0_i32_0 : i32, i32
  }
  func.func @transform_4(%arg0: i32, %arg1: i32, %arg2: i32) -> (i32, i32) {
    %c0_i32 = arith.constant 0 : i32
    %c0_i32_0 = arith.constant 0 : i32
    return %c0_i32, %arg2 : i32, i32
  }
  func.func @transform_5(%arg0: i32, %arg1: i32, %arg2: i32) -> (i32, i32) {
    %c0_i32 = arith.constant 0 : i32
    %c0_i32_0 = arith.constant 0 : i32
    return %arg2, %c0_i32 : i32, i32
  }
  func.func @transform_6(%arg0: i32, %arg1: i32, %arg2: i32) -> (i32, i32) {
    %c0_i32 = arith.constant 0 : i32
    %c0_i32_0 = arith.constant 0 : i32
    %c0_i32_1 = arith.constant 0 : i32
    return %c0_i32, %c0_i32_0 : i32, i32
  }
  func.func @transform_7(%arg0: i32, %arg1: i32, %arg2: i32) -> (i32, i32, i32) {
    %c0_i32 = arith.constant 0 : i32
    %c0_i32_0 = arith.constant 0 : i32
    return %arg0, %arg1, %c0_i32 : i32, i32, i32
  }
}

</mosaic_0001>

<bundles_post_ra>
// kernel: tpu_custom_call.1
= control target key start
LH: loop header
LB: loop body
LE: loop exit
PB: predicated region body
PF: predicated region fallthrough
CT: control target
= control target key end

     0   :  { %s1725_s0 = inlined_call_operand.hbm [shape: f32[2,8,32], index: 0, kind: input, shape index: {}]   ;;  %s1726_s1 = inlined_call_operand.hbm [shape: f32[2,1,64], index: 1, kind: input, shape index: {}]   ;;  %s1727_s2 = inlined_call_operand.hbm [shape: f32[1,32], index: 2, kind: input, shape index: {}]   ;;  %s1728_s3 = inlined_call_operand.hbm [shape: f32[1,32], index: 3, kind: input, shape index: {}]   ;;  %s1729_s4 = inlined_call_operand.hbm [shape: bf16[32,64], index: 4, kind: input, shape index: {}]   ;;  %s1730_s5 = inlined_call_operand.hbm [shape: bf16[64,32], index: 5, kind: input, shape index: {}]   ;;  %s1731_s6 = inlined_call_operand.hbm [shape: f32[1,32], index: 6, kind: input, shape index: {}]   ;;  %s1732_s7 = inlined_call_operand.hbm [shape: f32[2,8,32], index: 7, kind: output, shape index: {}]  }
   0x1   :  { %1738 = sst [smem:[#allocation23_spill]] %s1725_s0 }
   0x2   :  { %1739 = sst [smem:[#allocation24_spill]] %s1727_s2 }
   0x3   :  { %1740 = sst [smem:[#allocation25_spill]] %s1728_s3 }
   0x4   :  { %1741 = sst [smem:[#allocation26_spill]] %s1732_s7 }
   0x5   :  { %12 = vsyncpa [#allocation5], 0 }
   0x6   :  { %14 = vsyncpa [#allocation5 + $0x1], 0 }
   0x7   :  { %15 = vsyncpa [#allocation8], 0 }
   0x8   :  { %17 = vsyncpa [#allocation8 + $0x1], 0 }
   0x9   :  { %18 = vsyncpa [#allocation11], 0 }
   0xa   :  { %19 = vsyncpa [#allocation14], 0 }
   0xb   :  { %20 = vsyncpa [#allocation6], 0 }
   0xc   :  { %22 = vsyncpa [#allocation6 + $0x1], 0  ;;  %s1360_s24 = smov 0   ;;  %s1362_s25 = smov 0  }
   0xd   :  { %s1364_s26 = smov 0   ;;  %s1366_s27 = smov 0  }
   0xe   :  { %s1368_s28 = smov 0   ;;  %s1370_s29 = smov 0  }
   0xf LB: > { %s1391_s30 = sadd.s32 4294967295, %s1306_s29   ;;  %p816_p0 = scmp.ge.s32.totalorder %s1306_s29, 1  ;;  %s1306_s29 = sphi %s1370_s29, %s28_s29   ;;  %s1302_s28 = sphi %s1368_s28, %s1771_s28   ;;  %s1298_s27 = sphi %s1366_s27, %s1770_s27   ;;  %s1294_s26 = sphi %s1364_s26, %s1769_s26   ;;  %s1290_s25 = sphi %s1362_s25, %s1768_s25   ;;  %s1286_s24 = sphi %s1360_s24, %s1767_s24  }
  0x10   : > { %p1733_p1 = scmp.eq.s32.totalorder %s1391_s30, 0  ;;  %p251_p2 = scmp.lt.s32.totalorder %s1306_s29, 3 }
  0x11   : > { %s1308_s9 = smov [#allocation9]   ;;  %s1309_s11 = smov [#allocation10]  }
  0x12   : > { %p1396_p3 = pnand %p816_p0, %p251_p2  ;;  %s264_s10 = sshll.u32 %s1308_s9, 4  ;;  %s265_s10 = int_to_ptr.vmem [resolvable:$true] %s264_s10 }
  0x13   : > { %s275_s12 = sshll.u32 %s1309_s11, 4  ;;  %s1310_s14 = smov [#allocation13]   ;;  %s1409_s12 = int_to_ptr.vmem [resolvable:$true] %s275_s12 }
  0x14   : > { %s1742_s8 = scalar_select %p1396_p3, 1, 0 }
  0x15   : > { %p904_p5 = pneg %p1396_p3  ;;  %s1411_s15 = sshll.u32 %s1310_s14, 4  ;;  %s304_s15 = int_to_ptr.vmem [resolvable:$true] %s1411_s15 }
  0x16   : > { %s1744_s2 = sld [smem:[#allocation24_spill]] }
  0x17   : > { %p1405_p6 = pnand %p904_p5, %p1733_p1 }
  0x19   : > { %p1421_p8 = pneg %p1405_p6 }
  0x1c   : > { %s1008_s18 = scalar_lea.hbm %s1744_s2, 16 }
  0x1d   : > { %p1009_p7 = scmp.ne.s32.totalorder %s1744_s2, %s1008_s18  ;;  %p1015_p11 = scmp.lt.u32.totalorder %s1008_s18, %s1744_s2 }
  0x1f   : > { %p1011_p9 = pnand %p1421_p8, %p1009_p7 }
  0x21   : > { %p1012_p10 = pneg %p1011_p9 }
  0x23   : > { %p1017_p12 = pnand %p1015_p11, %p1012_p10 }
  0x25   : > { %1020 = shalt.err (!%p1017_p12)
}
  0x26   : > { %s1021_s9 = scalar_lea.vmem %s265_s10, 16  ;;  %s1028_s11 = scalar_lea.vmem %s265_s10, 32 }
  0x27   : > { %p1022_p13 = scmp.ne.s32.totalorder %s265_s10, %s1021_s9  ;;  %p1029_p5 = scmp.lt.s32.totalorder %s265_s10, %s265_s10 }
  0x28   : > { %p1030_p4 = scmp.lt.s32.totalorder %s1028_s11, %s1021_s9 }
  0x29   : > { %p1024_p0 = pnand %p1022_p13, %p1421_p8 }
  0x2a   : > { %p1031_p1 = por %p1030_p4, %p1029_p5 }
  0x2b   : > { %p1025_p2 = pneg %p1024_p0 }
  0x2d   : > { %p1032_p3 = pnand %p1031_p1, %p1025_p2 }
  0x2f   : > { %1035 = shalt.err (!%p1032_p3)
}
  0x30   : > { %907 = dma.hbm_to_vmem [thread:$0]  (!%p1405_p6), %s1744_s2, 16, %s265_s10, [#allocation8]  }
  0x31   : > { %s1746_s3 = sld [smem:[#allocation25_spill]] }
  0x37   : > { %s1036_s19 = scalar_lea.hbm %s1746_s3, 16 }
  0x38   : > { %p1037_p7 = scmp.ne.s32.totalorder %s1746_s3, %s1036_s19  ;;  %p1043_p1 = scmp.lt.u32.totalorder %s1036_s19, %s1746_s3 }
  0x3a   : > { %p1039_p9 = pnand %p1037_p7, %p1421_p8 }
  0x3c   : > { %p1040_p4 = pneg %p1039_p9 }
  0x3e   : > { %p1045_p3 = pnand %p1043_p1, %p1040_p4 }
  0x40   : > { %1048 = shalt.err (!%p1045_p3)
}
  0x41   : > { %s1049_s10 = scalar_lea.vmem %s1409_s12, 16  ;;  %s1056_s11 = scalar_lea.vmem %s1409_s12, 32 }
  0x42   : > { %p1050_p10 = scmp.ne.s32.totalorder %s1409_s12, %s1049_s10  ;;  %p1057_p13 = scmp.lt.s32.totalorder %s1409_s12, %s1409_s12 }
  0x43   : > { %p1058_p0 = scmp.lt.s32.totalorder %s1056_s11, %s1049_s10 }
  0x44   : > { %p1052_p11 = pnand %p1050_p10, %p1421_p8 }
  0x45   : > { %p1059_p2 = por %p1058_p0, %p1057_p13 }
  0x46   : > { %p1053_p12 = pneg %p1052_p11 }
  0x48   : > { %p1060_p5 = pnand %p1059_p2, %p1053_p12 }
  0x4a   : > { %1063 = shalt.err (!%p1060_p5)
}
  0x4b   : > { %910 = dma.hbm_to_vmem [thread:$0]  (!%p1405_p6), %s1746_s3, 16, %s1409_s12, [#allocation11]  }
  0x4c   : > { %s1064_s19 = scalar_lea.hbm %s1730_s5, 512 }
  0x4d   : > { %p1065_p7 = scmp.ne.s32.totalorder %s1730_s5, %s1064_s19  ;;  %p1071_p1 = scmp.lt.u32.totalorder %s1064_s19, %s1730_s5 }
  0x4f   : > { %p1067_p9 = pnand %p1065_p7, %p1421_p8 }
  0x51   : > { %p1068_p4 = pneg %p1067_p9 }
  0x53   : > { %p1073_p3 = pnand %p1071_p1, %p1068_p4 }
  0x55   : > { %1076 = shalt.err (!%p1073_p3)
}
  0x56   : > { %s1077_s10 = scalar_lea.vmem %s304_s15, 512  ;;  %p1085_p13 = scmp.lt.s32.totalorder %s304_s15, %s304_s15 }
  0x57   : > { %p1078_p10 = scmp.ne.s32.totalorder %s304_s15, %s1077_s10  ;;  %p1086_p0 = scmp.lt.s32.totalorder %s1077_s10, %s1077_s10 }
  0x59   : > { %p1080_p11 = pnand %p1078_p10, %p1421_p8  ;;  %p1087_p2 = por %p1086_p0, %p1085_p13 }
  0x5b   : > { %p1081_p12 = pneg %p1080_p11 }
  0x5d   : > { %p1088_p5 = pnand %p1087_p2, %p1081_p12 }
  0x5f   : > { %1091 = shalt.err (!%p1088_p5)
}
  0x60   : > { %s1311_s12 = smov 64   ;;  %s1312_s11 = smov 4  }
  0x61   : > { %916 = dma.hbm_to_vmem [thread:$0]  (!%p1405_p6), %s1730_s5, 512, %s304_s15, [#allocation14], %s1311_s12, %s1311_s12, %s1312_s11  }
  0x62   : > { %s1313_s17 = smov [#allocation12]   ;;  %s1314_s19 = smov [#allocation15]  }
  0x63   : > { %s287_s18 = sshll.u32 %s1313_s17, 4  ;;  %s317_s20 = sshll.u32 %s1314_s19, 4  ;;  %s288_s18 = int_to_ptr.vmem [resolvable:$true] %s287_s18  ;;  %s318_s20 = int_to_ptr.vmem [resolvable:$true] %s317_s20 }
  0x64   : > { %s1092_s9 = scalar_lea.hbm %s1729_s4, 256 }
  0x65   : > { %p1093_p7 = scmp.ne.s32.totalorder %s1729_s4, %s1092_s9  ;;  %p1099_p1 = scmp.lt.u32.totalorder %s1092_s9, %s1729_s4 }
  0x67   : > { %p1095_p9 = pnand %p1093_p7, %p1421_p8 }
  0x69   : > { %p1096_p4 = pneg %p1095_p9 }
  0x6b   : > { %p1101_p3 = pnand %p1099_p1, %p1096_p4 }
  0x6d   : > { %1104 = shalt.err (!%p1101_p3)
}
  0x6e   : > { %s1105_s15 = scalar_lea.vmem %s288_s18, 256  ;;  %p1113_p13 = scmp.lt.s32.totalorder %s288_s18, %s288_s18 }
  0x6f   : > { %p1106_p10 = scmp.ne.s32.totalorder %s288_s18, %s1105_s15  ;;  %p1114_p0 = scmp.lt.s32.totalorder %s1105_s15, %s1105_s15 }
  0x71   : > { %p1108_p11 = pnand %p1106_p10, %p1421_p8  ;;  %p1115_p2 = por %p1114_p0, %p1113_p13 }
  0x73   : > { %p1109_p12 = pneg %p1108_p11 }
  0x75   : > { %p1116_p5 = pnand %p1115_p2, %p1109_p12 }
  0x77   : > { %1119 = shalt.err (!%p1116_p5)
}
  0x78   : > { %913 = dma.hbm_to_vmem [thread:$0]  (!%p1405_p6), %s1729_s4, 256, %s288_s18, [#allocation11], %s1311_s12, %s1311_s12, %s1312_s11  }
  0x79   : > { %s1120_s16 = scalar_lea.hbm %s1731_s6, 16 }
  0x7a   : > { %p1121_p7 = scmp.ne.s32.totalorder %s1731_s6, %s1120_s16  ;;  %p1127_p1 = scmp.lt.u32.totalorder %s1120_s16, %s1731_s6 }
  0x7c   : > { %p1123_p9 = pnand %p1121_p7, %p1421_p8 }
  0x7e   : > { %p1124_p4 = pneg %p1123_p9 }
  0x80   : > { %p1129_p3 = pnand %p1127_p1, %p1124_p4 }
  0x82   : > { %1132 = shalt.err (!%p1129_p3)
}
  0x83   : > { %s1133_s9 = scalar_lea.vmem %s318_s20, 16  ;;  %s1140_s12 = scalar_lea.vmem %s318_s20, 32 }
  0x84   : > { %p1134_p10 = scmp.ne.s32.totalorder %s318_s20, %s1133_s9  ;;  %p1141_p13 = scmp.lt.s32.totalorder %s318_s20, %s318_s20 }
  0x85   : > { %p1142_p0 = scmp.lt.s32.totalorder %s1140_s12, %s1133_s9 }
  0x86   : > { %p1136_p11 = pnand %p1134_p10, %p1421_p8 }
  0x87   : > { %p1143_p2 = por %p1142_p0, %p1141_p13 }
  0x88   : > { %p1137_p12 = pneg %p1136_p11 }
  0x8a   : > { %p1144_p5 = pnand %p1143_p2, %p1137_p12 }
  0x8c   : > { %1147 = shalt.err (!%p1144_p5)
}
  0x8d   : > { %919 = dma.hbm_to_vmem [thread:$0]  (!%p1405_p6), %s1731_s6, 16, %s318_s20, [#allocation14]  }
  0x8e   : > { %s815_s21 = sadd.s32 4294967294, %s1306_s29   ;;  %s47_s10 = sadd.s32 1, %s1302_s28 }
  0x8f   : > { %s56_s13 = sadd.s32 1, %s1294_s26  ;;  %p49_p8 = scmp.ge.s32.totalorder %s47_s10, 2 }
  0x90   : > { %p63_p7 = scmp.ne.s32.totalorder %s1294_s26, %s1290_s25  ;;  %p64_p9 = scmp.eq.s32.totalorder %s1306_s29, 0 }
  0x91   : > { %p69_p4 = scmp.ne.s32.totalorder %s1290_s25, %s1286_s24  ;;  %s1773_s10 = smov (%p49_p8, %s47_s10), 0 }
  0x92   : > { %p1526_p1 = por %p64_p9, %p63_p7  ;;  %p1748_p3 = scmp.eq.s32.totalorder %s1391_s30, 0 }
  0x93   : > { %s51_s2 = ssub.s32 %s1302_s28, %s1773_s10  ;;  %p238_p10 = scmp.eq.s32.totalorder %s1391_s30, 1 }
  0x94   : > { %p1532_p6 = por %p1748_p3, %p69_p4  ;;  %p54_p11 = scmp.eq.s32.totalorder %s51_s2, 0 }
  0x95   : > { %p244_p12 = scmp.eq.s32.totalorder %s815_s21, 1  ;;  %p1539_p13 = por %p238_p10, %p63_p7 }
  0x96   : > { %s1749_s20 = scalar_select %p1532_p6, 1, 0 }
  0x97   : > { %s1750_s14 = scalar_select %p1539_p13, 1, 0 }
  0x98   : > { %p936_p0 = scmp.lt.s32.totalorder %s1306_s29, 2  ;;  %p1547_p2 = por %p244_p12, %p69_p4 }
  0x99   : > { %s1545_s3 = scalar_select %p54_p11, %s1294_s26, %s56_s13  }
  0x9a   : > { %s1751_s7 = scalar_select %p1547_p2, 1, 0 }
  0x9b   : > { %s1552_s16 = sand.u32 1, %s1294_s26   ;;  %s824_s19 = sshll.u32 %s1302_s28, 7 }
  0x9c   : > { %s823_s17 = sshll.u32 %s1552_s16, 3  ;;  %s1752_s0 = sld [smem:[#allocation23_spill]] }
  0x9d   : > { %s332_s12 = scalar_lea.vmem [#allocation4], %s823_s17  ;;  %p1565_p5 = pnand %p936_p0, %p1526_p1 }
  0x9e   : > { %s340_s11 = sshll.u32 %s332_s12, 4  ;;  %s329_s13 = scalar_lea.sflag [#allocation5], %s1552_s16  ;;  %s1561_s11 = int_to_ptr.vmem [resolvable:$true] %s340_s11 }
  0x9f   : > { %p1150_p7 = pneg %p1565_p5 }
  0xa2   : > { %s1559_s9 = scalar_lea.hbm %s1752_s0, %s824_s19  ;;  %s1153_s15 = scalar_lea.hbm %s1752_s0, 256 }
  0xa3   : > { %s1148_s2 = scalar_lea.hbm %s1559_s9, 128  ;;  %p1154_p1 = scmp.lt.u32.totalorder %s1559_s9, %s1752_s0 }
  0xa4   : > { %p1149_p8 = scmp.ne.s32.totalorder %s1559_s9, %s1148_s2  ;;  %p1155_p3 = scmp.lt.u32.totalorder %s1153_s15, %s1148_s2 }
  0xa5   : > { %p1157_p11 = scmp.lt.u32.totalorder %s1148_s2, %s1559_s9 }
  0xa6   : > { %p1151_p9 = pnand %p1150_p7, %p1149_p8  ;;  %p1156_p10 = por %p1155_p3, %p1154_p1 }
  0xa8   : > { %p1152_p4 = pneg %p1151_p9  ;;  %p1158_p12 = por %p1157_p11, %p1156_p10 }
  0xaa   : > { %p1159_p0 = pnand %p1158_p12, %p1152_p4 }
  0xac   : > { %1162 = shalt.err (!%p1159_p0)
}
  0xad   : > { %s1163_s12 = scalar_lea.vmem %s1561_s11, 128  ;;  %s1315_s17 = smov [#allocation4]  }
  0xae   : > { %p1164_p8 = scmp.ne.s32.totalorder %s1561_s11, %s1163_s12  ;;  %s1168_s19 = sshll.u32 %s1315_s17, 4  ;;  %s1169_s19 = int_to_ptr.vmem [resolvable:$false] %s1168_s19 }
  0xaf   : > { %s1170_s22 = scalar_lea.vmem %s1169_s19, 256  ;;  %p1171_p13 = scmp.lt.s32.totalorder %s1561_s11, %s1169_s19 }
  0xb0   : > { %p1166_p9 = pnand %p1164_p8, %p1150_p7  ;;  %p1172_p1 = scmp.lt.s32.totalorder %s1170_s22, %s1163_s12 }
  0xb2   : > { %p1167_p2 = pneg %p1166_p9  ;;  %p1173_p3 = por %p1172_p1, %p1171_p13 }
  0xb4   : > { %p1174_p10 = pnand %p1173_p3, %p1167_p2 }
  0xb6   : > { %1177 = shalt.err (!%p1174_p10)
}
  0xb7   : > { %923 = dma.hbm_to_vmem [thread:$0]  (!%p1565_p5), %s1559_s9, 128, %s1561_s11, %s329_s13  }
  0xb8   : > { %s825_s2 = sshll.u32 %s1302_s28, 4  ;;  %s350_s15 = scalar_lea.vmem [#allocation7], %s1552_s16 }
  0xb9   : > { %s358_s23 = sshll.u32 %s350_s15, 4  ;;  %s1601_s19 = scalar_lea.hbm %s1726_s1, %s825_s2  ;;  %s359_s23 = int_to_ptr.vmem [resolvable:$true] %s358_s23 }
  0xba   : > { %s1754_s12 = sand.u32 1, %s1306_s29   ;;  %s1178_s0 = scalar_lea.hbm %s1601_s19, 16 }
  0xbb   : > { %s348_s22 = scalar_lea.sflag [#allocation8], %s1754_s12  ;;  %p1179_p13 = scmp.ne.s32.totalorder %s1601_s19, %s1178_s0 }
  0xbc   : > { %s1183_s11 = scalar_lea.hbm %s1726_s1, 32  ;;  %p1184_p11 = scmp.lt.u32.totalorder %s1601_s19, %s1726_s1 }
  0xbd   : > { %p1181_p2 = pnand %p1179_p13, %p1150_p7  ;;  %p1185_p12 = scmp.lt.u32.totalorder %s1183_s11, %s1178_s0 }
  0xbe   : > { %p1187_p8 = scmp.lt.u32.totalorder %s1178_s0, %s1601_s19 }
  0xbf   : > { %p1182_p4 = pneg %p1181_p2  ;;  %p1186_p0 = por %p1185_p12, %p1184_p11 }
  0xc1   : > { %p1188_p9 = por %p1187_p8, %p1186_p0 }
  0xc3   : > { %p1189_p1 = pnand %p1188_p9, %p1182_p4 }
  0xc5   : > { %1192 = shalt.err (!%p1189_p1)
}
  0xc6   : > { %s1193_s2 = scalar_lea.vmem %s359_s23, 16  ;;  %s1316_s15 = smov [#allocation7]  }
  0xc7   : > { %p1194_p3 = scmp.ne.s32.totalorder %s359_s23, %s1193_s2  ;;  %s1198_s17 = sshll.u32 %s1316_s15, 4  ;;  %s1199_s17 = int_to_ptr.vmem [resolvable:$false] %s1198_s17 }
  0xc8   : > { %s1200_s12 = scalar_lea.vmem %s1199_s17, 32  ;;  %p1201_p2 = scmp.lt.s32.totalorder %s359_s23, %s1199_s17 }
  0xc9   : > { %p1196_p10 = pnand %p1194_p3, %p1150_p7  ;;  %p1202_p6 = scmp.lt.s32.totalorder %s1200_s12, %s1193_s2 }
  0xcb   : > { %p1197_p13 = pneg %p1196_p10  ;;  %p1203_p11 = por %p1202_p6, %p1201_p2 }
  0xcd   : > { %p1204_p12 = pnand %p1203_p11, %p1197_p13 }
  0xcf   : > { %1207 = shalt.err (!%p1204_p12)
}
  0xd0   : > { %926 = dma.hbm_to_vmem [thread:$0]  (!%p1565_p5), %s1601_s19, 16, %s359_s23, %s348_s22  }
  0xd1   : > { %p1755_p4 = scmp.ne.s32.totalorder %s1742_s8, 0 }
  0xd2   : > { %s1627_s0 = sand.u32 (!%p1755_p4), 1, %s1290_s25   ;;  %p1756_p6 = scmp.ne.s32.totalorder (!%p1755_p4), %s1749_s20, 0 }
  0xd3   : > { %367 = sbr.rel (%p1755_p4) target bundleno = 870 (0x366), region = 48  ;;  %s827_s16 = sshll.u32 (!%p1755_p4), %s1627_s0, 3 }
  0xd4   : > { %s370_s9 = scalar_lea.sflag (!%p1755_p4), [#allocation5], %s1627_s0  ;;  %s373_s11 = scalar_lea.vmem (!%p1755_p4), [#allocation4], %s827_s16 }
  0xda   : > { %1261 = dma.done.wait (%p1756_p6), %s370_s9, 128  }
  0xdb   : > { %1263 = vsyncadd (%p1756_p6), %s370_s9, 4294967168  ;;  %s378_s8 = sand.u32 1, %s1391_s30   ;;  %s381_s23 = scalar_lea.vmem [#allocation7], %s1627_s0 }
  0xdc   : > { %s379_s18 = scalar_lea.sflag [#allocation8], %s378_s8 }
  0xdd   : > { %1265 = dma.done.wait (%p1756_p6), %s379_s18, 16  }
  0xde   : > { %1267 = vsyncadd (%p1756_p6), %s379_s18, 4294967280  ;;  %p1757_p5 = scmp.eq.s32.totalorder %s1391_s30, 0 }
  0xe0   : > { %1269 = dma.done.wait (%p1757_p5), [#allocation8], 16   ;;  %p1758_p7 = pmov %p1757_p5 }
  0xe1   : > { %p1759_p0 = pmov %p1757_p5 }
  0xe2   : > { %1271 = vsyncadd (%p1758_p7), [#allocation8], 4294967280 }
  0xe3   : > { %1273 = dma.done.wait (%p1759_p0), [#allocation11], 272   ;;  %p1760_p8 = pmov %p1759_p0 }
  0xe4   : > { %p1761_p9 = pmov %p1759_p0 }
  0xe5   : > { %1275 = vsyncadd (%p1760_p8), [#allocation11], 4294967024 }
  0xe6   : > { %1277 = dma.done.wait (%p1761_p9), [#allocation14], 528   ;;  %p1762_p1 = pmov %p1759_p0 }
  0xe7   : > { %vm443_vm0 = vcmask 261120   ;;  %v1655_v0 = vld [vmem:[%s373_s11] sm:$0xff]  ;;  %v1000_v4 = vld [vmem:[#allocation12] sm:$0xff]   ;;  %v1317_v5 = vmov 0.0   ;;  %vm1318_vm1 = vmmov 0   ;;  %vm477_vm2 = vcmask 257024  }
  0xe8   : > { %1279 = vsyncadd (%p1762_p1), [#allocation14], 4294966768  ;;  %v444_v1 = vsel %vm443_vm0, %v1655_v0, 0.0  ;;  %v449_v2 = vmul.f32 %v1655_v0, %v1655_v0  ;;  %858 = vmatprep.subr.bf16.mxu0 %v1317_v5  ;;  %479 = vst.msk [vmem:[#allocation3] sm:$0xff] %vm443_vm0, %v1317_v5  ;;  %866 = vmatprep.subr.bf16.mxu1 %v1317_v5  ;;  %v1001_v6 = vld [vmem:[#allocation12 + $0x8] sm:$0xff]   ;;  %v1002_v7 = vld [vmem:[#allocation13] sm:$0xff]  }
  0xe9   : > { %445 = vadd.xlane.f32.xlu0 %v444_v1  ;;  %859 = vmatpush3.bf16.msra.mxu0 %v1000_v4  ;;  %v1003_v8 = vld [vmem:[#allocation13 + $0x8] sm:$0xff]   ;;  %v1004_v25 = vld [vmem:[#allocation13 + $0x10] sm:$0xff]   ;;  %v1005_v26 = vld [vmem:[#allocation13 + $0x18] sm:$0xff]   ;;  %vm583_vm3 = vcmask 523264   ;;  %s847_s30 = sshll.u32 %s1298_s27, 7  ;;  %s435_s20 = scalar_lea.vmem [#allocation16], %s827_s16 }
  0xea   : > { %v450_v3 = vsel %vm443_vm0, %v449_v2, 0.0  ;;  %862 = vmatprep.mubr.msk.bf16.mxu0 %vm1318_vm1, %v1317_v5  ;;  %860 = vmatprep.subr.bf16.mxu0 %v1317_v5  ;;  %v834_v18 = vld [vmem:[#allocation9] ss:$0 sm:$0xff]  ;;  %v835_v20 = vld [vmem:[#allocation10] ss:$0 sm:$0xff]  ;;  %s659_s19 = sshll.u32 %s435_s20, 4  ;;  %s1677_s19 = int_to_ptr.vmem [resolvable:$true] %s659_s19 }
  0xeb   : > { %874 = vmatprep.mubr.msk.bf16.mxu1 %vm1318_vm1, %v1317_v5  ;;  %867 = vmatpush3.bf16.msra.mxu1 %v1002_v7  ;;  %v836_v27 = vld [vmem:[%s381_s23] ss:$0 sm:$0xff]  ;;  %v845_v41 = vld [vmem:[#allocation15] ss:$0 sm:$0xff]  ;;  %s1763_s13 = sld [smem:[#allocation26_spill]]  ;;  %s645_s15 = scalar_lea.sflag [#allocation6], %s1627_s0 }
  0xec   : > { %868 = vmatprep.subr.bf16.mxu1 %v1317_v5  ;;  %s1208_s27 = scalar_lea.vmem %s1677_s19, 128  ;;  %p1764_p10 = scmp.ne.s32.totalorder %s1750_s14, 0 }
  0xed   : > { %451 = vadd.xlane.f32.xlu0 %v450_v3  ;;  %861 = vmatpush3.bf16.msra.mxu0 %v1001_v6  ;;  %p1209_p3 = scmp.ne.s32.totalorder %s1677_s19, %s1208_s27  ;;  %s1319_s17 = smov [#allocation16]  }
  0xee   : > { %s1212_s12 = sshll.u32 %s1319_s17, 4  ;;  %s1213_s12 = int_to_ptr.vmem [resolvable:$false] %s1212_s12 }
  0xef   : > { %869 = vmatpush3.bf16.msra.mxu1 %v1003_v8  ;;  %v549_v35 = vld [vmem:[#allocation3] sm:$0xff]  ;;  %p1210_p13 = pnand %p1209_p3, %p1764_p10  ;;  %s1214_s16 = scalar_lea.vmem %s1213_s12, 256 }
  0xf0   : > { %870 = vmatprep.subr.bf16.mxu1 %v1317_v5  ;;  %p1215_p11 = scmp.lt.s32.totalorder %s1677_s19, %s1213_s12  ;;  %p1216_p12 = scmp.lt.s32.totalorder %s1214_s16, %s1208_s27 }
  0xf1   : > { %s1675_s2 = scalar_lea.hbm %s1763_s13, %s847_s30  ;;  %p1211_p2 = pneg %p1210_p13 }
  0xf2   : > { %p1217_p4 = por %p1216_p12, %p1215_p11 }
  0xf3   : > { %871 = vmatpush3.bf16.msra.mxu1 %v1004_v25 }
  0xf4   : > { %872 = vmatprep.subr.bf16.mxu1 %v1317_v5  ;;  %p1218_p6 = pnand %p1217_p4, %p1211_p2 }
  0xf7   : > { %873 = vmatpush3.bf16.msra.mxu1 %v1005_v26 }
 0x176   : > { %v446_v9 = vpop.xlane.xlu0 %445 }
 0x177   : > { %v448_v10 = vmul.f32 0.03125, %v446_v9 }
 0x179   : > { %v454_v12 = vmul.f32 %v448_v10, %v448_v10  ;;  %v456_v16 = vsub.f32 %v1655_v0, %v448_v10 }
 0x17a   : > { %v452_v11 = vpop.xlane.xlu0 %451 }
 0x17b   : > { %v453_v13 = vmul.f32 0.03125, %v452_v11 }
 0x17d   : > { %v455_v14 = vsub.f32 %v453_v13, %v454_v12 }
 0x17f   : > { %v457_v15 = vadd.f32 1e-06, %v455_v14 }
 0x181   : > { %1006 = vrsqrt.f32 %v457_v15 }
 0x18b   : > { %v1007_v17 = vpop.eup %1006 }
 0x18c   : > { %v459_v19 = vmul.f32 %v1007_v17, %v456_v16 }
 0x18e   : > { %v467_v21 = vmul.f32 %v834_v18, %v459_v19 }
 0x190   : > { %v475_v22 = vadd.f32 %v835_v20, %v467_v21 }
 0x192   : > { %v476_v23 = vpack.c.bf16 %v475_v22, %v475_v22 }
 0x194   : > { %478 = vst.msk [vmem:[#allocation2] sm:$0xf] %vm477_vm2, %v476_v23 }
 0x19b   : > { %v480_v24 = vld [vmem:[#allocation2] sm:$0xf] }
 0x19c   : > { %863 = vmatmul.mubr.msk.bf16.vlgmr.msra.gmra.mrb[0].mxu0 %vm443_vm0, %v480_v24 }
 0x26f   : > { %v542_v28 = vpop.f32.mrb[0].mxu0 }
 0x270   : > { %v543_v29 = vadd.f32 %v836_v27, %v542_v28  ;;  %v864_v30 = vpop.f32.mrb[1].mxu0 }
 0x271   : > { %v545_v31 = vpop.f32.mrb[2].mxu0 }
 0x272   : > { %v548_v32 = vmax.f32 %v543_v29, 0.0  ;;  %v865_v33 = vpop.f32.mrb[3].mxu0 }
 0x274   : > { %v550_v34 = vpack.c.bf16 %v548_v32, %v548_v32 }
 0x276   : > { %875 = vmatmul.mubr.msk.bf16.vlgmr.msra.gmra.mrb[0].mxu1 %vm583_vm3, %v550_v34 }
 0x349   : > { %v621_v36 = vpop.f32.mrb[0].mxu1 }
 0x34a   : > { %v627_v37 = vadd.f32 %v621_v36, %v549_v35  ;;  %v876_v38 = vpop.f32.mrb[1].mxu1 }
 0x34b   : > { %v624_v39 = vpop.f32.mrb[2].mxu1 }
 0x34c   : > { %628 = vst.msk [vmem:[#allocation3] sm:$0xff] %vm443_vm0, %v627_v37  ;;  %v877_v40 = vpop.f32.mrb[3].mxu1 }
 0x353   : > { %v632_v42 = vld [vmem:[#allocation3] sm:$0xff] }
 0x354   : > { %v640_v43 = vadd.f32 %v845_v41, %v632_v42 }
 0x356   : > { %v642_v44 = vadd.f32 %v640_v43, %v1655_v0 }
 0x358   : > { %643 = vst.msk [vmem:[%s435_s20] sm:$0xff] %vm443_vm0, %v642_v44 }
 0x359   : > { %1221 = shalt.err (!%p1218_p6)
}
 0x35a   : > { %s1222_s0 = scalar_lea.hbm %s1675_s2, 128  ;;  %s1226_s8 = scalar_lea.hbm %s1763_s13, 256 }
 0x35b   : > { %p1223_p5 = scmp.ne.s32.totalorder %s1675_s2, %s1222_s0  ;;  %p1227_p8 = scmp.lt.u32.totalorder %s1675_s2, %s1763_s13 }
 0x35c   : > { %p1228_p9 = scmp.lt.u32.totalorder %s1226_s8, %s1222_s0  ;;  %p1230_p3 = scmp.lt.u32.totalorder %s1222_s0, %s1675_s2 }
 0x35d   : > { %p1224_p7 = pnand %p1223_p5, %p1764_p10 }
 0x35e   : > { %p1229_p1 = por %p1228_p9, %p1227_p8 }
 0x35f   : > { %p1225_p0 = pneg %p1224_p7 }
 0x360   : > { %p1231_p13 = por %p1230_p3, %p1229_p1 }
 0x362   : > { %p1232_p2 = pnand %p1231_p13, %p1225_p0 }
 0x364   : > { %1235 = shalt.err (!%p1232_p2)
}
 0x365   : > { %902 = dma.vmem_to_hbm [thread:$0]  (%p1764_p10), %s1677_s19, 128, %s1675_s2, %s645_s15  }
 0x366 PF: > { %s671_s30 = sand.u32 1, %s1286_s24   ;;  %p1765_p11 = scmp.ne.s32.totalorder %s1751_s7, 0 }
 0x367   : > { %p1766_p12 = scmp.ge.s32.totalorder %s1306_s29, 2  ;;  %s672_s20 = scalar_lea.sflag [#allocation6], %s671_s30 }
 0x369   : > { %p928_p4 = pnand %p1766_p12, %p1765_p11 }
 0x36b   : > { %1281 = dma.done.wait (!%p928_p4), %s672_s20, 128  }
 0x36c   : > { %1283 = vsyncadd (!%p928_p4), %s672_s20, 4294967168  ;;  %s28_s29 = sadd.s32 1, %s1306_s29   ;;  %s1767_s24 = smov %s1290_s25 }
 0x36d   : > { %p25_p6 = scmp.ge.s32.totalorder %s28_s29, 4   ;;  %s1768_s25 = smov %s1294_s26 }
 0x36e   : > { %s1769_s26 = smov %s1545_s3  ;;  %s1770_s27 = smov %s1302_s28 }
 0x36f   : > { %s1771_s28 = smov %s1773_s10  ;;  %27 = sbr.rel (!%p25_p6) target bundleno = 15 (0xf), region = 136 }
 0x376   :  { %677 = vsyncpa [#allocation5], 1 }
 0x377   :  { %679 = vsyncpa [#allocation5 + $0x1], 1 }
 0x378   :  { %680 = vsyncpa [#allocation8], 1 }
 0x379   :  { %682 = vsyncpa [#allocation8 + $0x1], 1 }
 0x37a   :  { %683 = vsyncpa [#allocation11], 1 }
 0x37b   :  { %684 = vsyncpa [#allocation14], 1 }
 0x37c   :  { %685 = vsyncpa [#allocation6], 1 }
 0x37d   :  { %687 = vsyncpa [#allocation6 + $0x1], 1 }

</bundles_post_ra>
